<compile_context>
chip_gen: v7x
topology: tpu7x:2x2x1
jax: 0.10.0
libtpu: 0.0.40
codegen_flags: <defaults>
</compile_context>

<pallas_src>
import functools

import jax
import jax.numpy as jnp
from jax.experimental import pallas as pl
from jax.experimental.pallas import tpu as pltpu


C_PAD = 128  # lane-dense padded class dimension (full vreg lane width)


def gcn_kernel(x_ref, adj_ref, w1_ref, b1_ref, w2_ref, b2_ref, out_ref, *, nclass):
    x = x_ref[...]
    adj = adj_ref[...]

    # gc1: relu(adj @ (x @ W1) + b1)
    support1 = jnp.dot(x, w1_ref[...], preferred_element_type=jnp.float32)
    h1 = jnp.dot(adj, support1, preferred_element_type=jnp.float32) + b1_ref[...]
    h1 = jnp.maximum(h1, 0.0)

    # dropout: eval-mode (training=False) == identity.
    # TODO(synk): training-mode dropout (pltpu.prng_* mask + 1/(1-p) scaling) not implemented.
    # TODO(synk): optional gaussian "variance" noise branch (variance is not None) not implemented.

    # gc2 with lane-dense (padded-to-128) classifier weight/bias.
    support2 = jnp.dot(h1, w2_ref[...], preferred_element_type=jnp.float32)
    z = jnp.dot(adj, support2, preferred_element_type=jnp.float32) + b2_ref[...]

    # log_softmax over the first `nclass` lanes only (padded lanes masked out).
    lane = jax.lax.broadcasted_iota(jnp.int32, z.shape, dimension=1)
    valid = lane < nclass
    z_valid = jnp.where(valid, z, jnp.float32(-3.0e38))
    z_max = jnp.max(z_valid, axis=1, keepdims=True)
    p = jnp.where(valid, jnp.exp(z - z_max), 0.0)
    lse = jnp.log(jnp.sum(p, axis=1, keepdims=True))

    # Padded lanes hold garbage values; the wrapper slices them off.  The store
    # itself stays a full 128-lane unmasked store.
    out_ref[...] = z - z_max - lse


def prepare_params(w1, b1, w2, b2):
    """One-time layout prep (no per-call transposes/reshapes).

    GraphConvolution stores weights as (in_features, out_features) already, so
    no transpose is needed.  Biases become (1, out).  The classifier weight and
    bias are zero-padded to C_PAD output lanes for a lane-dense output store.
    """
    nhid, nclass = w2.shape
    w2p = jnp.zeros((nhid, C_PAD), jnp.float32).at[:, :nclass].set(w2)
    b2p = jnp.zeros((1, C_PAD), jnp.float32).at[:, :nclass].set(b2)
    return dict(
        w1=jnp.asarray(w1, jnp.float32),
        b1=jnp.asarray(b1, jnp.float32)[None, :],
        w2p=w2p,
        b2p=b2p,
        nclass=int(nclass),
    )


@functools.partial(jax.jit, static_argnames=("nclass",))
def _gcn_call(x, adj, w1, b1, w2p, b2p, *, nclass):
    N, nfeat = x.shape
    nhid = w1.shape[1]

    full = lambda shape: pl.BlockSpec(shape, lambda: tuple(0 for _ in shape))

    out_padded = pl.pallas_call(
        functools.partial(gcn_kernel, nclass=nclass),
        out_shape=jax.ShapeDtypeStruct((N, C_PAD), jnp.float32),
        in_specs=[
            full((N, nfeat)),     # x
            full((N, N)),         # normalized adjacency (dense)
            full((nfeat, nhid)),  # W1 (in, out)
            full((1, nhid)),      # b1
            full((nhid, C_PAD)),  # W2 padded to 128 lanes
            full((1, C_PAD)),     # b2 padded
        ],
        out_specs=full((N, C_PAD)),
        compiler_params=pltpu.CompilerParams(dimension_semantics=()),
    )(x, adj, w1, b1, w2p, b2p)

    return out_padded[:, :nclass]


def gcn_forward(x, adj, prep):
    return _gcn_call(x, adj, prep["w1"], prep["b1"], prep["w2p"], prep["b2p"],
                     nclass=prep["nclass"])


# ----------------------------- test harness ---------------------------------

def init_gc_params(key, in_f, out_f):
    """GraphConvolution.reset_parameters: uniform(-stdv, stdv), stdv = 1/sqrt(out_f)."""
    kw, kb = jax.random.split(key)
    stdv = 1.0 / jnp.sqrt(jnp.float32(out_f))
    w = jax.random.uniform(kw, (in_f, out_f), jnp.float32, -stdv, stdv)
    b = jax.random.uniform(kb, (out_f,), jnp.float32, -stdv, stdv)
    return w, b


def normalize_adj(adj):
    """D^-1/2 (A + I) D^-1/2 (dense), mimicking utils.normalize_adj_tensor."""
    a = adj + jnp.eye(adj.shape[0], dtype=adj.dtype)
    d_inv_sqrt = 1.0 / jnp.sqrt(jnp.sum(a, axis=1))
    return a * d_inv_sqrt[:, None] * d_inv_sqrt[None, :]


def reference_forward(x, adj, w1, b1, w2, b2):
    hp = jax.lax.Precision.HIGHEST
    dot = lambda a, b: jnp.dot(a, b, precision=hp)
    h1 = jnp.maximum(dot(adj, dot(x, w1)) + b1, 0.0)
    z = dot(adj, dot(h1, w2)) + b2
    return jax.nn.log_softmax(z, axis=1)


if __name__ == "__main__":
    # Small shapes consistent with the module: N=64 nodes, nfeat=32, nhid=32, nclass=7.
    N, nfeat, nhid, nclass = 64, 32, 32, 7

    key = jax.random.PRNGKey(0)
    kx, ka, k1, k2 = jax.random.split(key, 4)

    x = jax.random.normal(kx, (N, nfeat), jnp.float32)

    # Random undirected graph, symmetrically normalized with self-loops.
    a_raw = (jax.random.uniform(ka, (N, N)) < 0.1).astype(jnp.float32)
    a_raw = jnp.maximum(a_raw, a_raw.T)
    adj = normalize_adj(a_raw)

    w1, b1 = init_gc_params(k1, nfeat, nhid)
    w2, b2 = init_gc_params(k2, nhid, nclass)

    prep = prepare_params(w1, b1, w2, b2)           # one-time layout conversion
    out = jax.block_until_ready(gcn_forward(x, adj, prep))

    ref = reference_forward(x, adj, w1, b1, w2, b2)
    assert out.shape == (N, nclass)
    err = float(jnp.max(jnp.abs(out - ref)))
    assert jnp.allclose(out, ref, atol=2e-5, rtol=2e-5), f"max abs err = {err}"

    print("KERNEL_OK")
</pallas_src>

<mosaic_0001>
module attributes {stable_mosaic.version = 11 : i64} {
  func.func @gcn_kernel(%arg0: memref<64x32xf32, #tpu.memory_space<vmem>>, %arg1: memref<64x64xf32, #tpu.memory_space<vmem>>, %arg2: memref<32x32xf32, #tpu.memory_space<vmem>>, %arg3: memref<1x32xf32, #tpu.memory_space<vmem>>, %arg4: memref<32x128xf32, #tpu.memory_space<vmem>>, %arg5: memref<1x128xf32, #tpu.memory_space<vmem>>, %arg6: memref<64x128xf32, #tpu.memory_space<vmem>>) attributes {dimension_semantics = [], scalar_prefetch = 0 : i64, scratch_operands = 0 : i64, tpu.core_type = #tpu.core_type<tc>} {
    %c0 = arith.constant 0 : index
    %c0_0 = arith.constant 0 : index
    %0 = vector.load %arg0[%c0, %c0_0] : memref<64x32xf32, #tpu.memory_space<vmem>>, vector<64x32xf32>
    %c0_1 = arith.constant 0 : index
    %c0_2 = arith.constant 0 : index
    %1 = vector.load %arg1[%c0_1, %c0_2] : memref<64x64xf32, #tpu.memory_space<vmem>>, vector<64x64xf32>
    %c0_3 = arith.constant 0 : index
    %c0_4 = arith.constant 0 : index
    %2 = vector.load %arg2[%c0_3, %c0_4] : memref<32x32xf32, #tpu.memory_space<vmem>>, vector<32x32xf32>
    %cst = arith.constant dense<0.000000e+00> : vector<64x32xf32>
    %3 = tpu.matmul %0, %2, %cst {dimension_numbers = #tpu.dot_dimension_numbers<[1], [0], [0], [1], [0, 0, 1, 1], [], []>} : vector<64x32xf32>, vector<32x32xf32>, vector<64x32xf32> -> vector<64x32xf32>
    %cst_5 = arith.constant dense<0.000000e+00> : vector<64x32xf32>
    %4 = tpu.matmul %1, %3, %cst_5 {dimension_numbers = #tpu.dot_dimension_numbers<[1], [0], [0], [1], [0, 0, 1, 1], [], []>} : vector<64x64xf32>, vector<64x32xf32>, vector<64x32xf32> -> vector<64x32xf32>
    %c0_6 = arith.constant 0 : index
    %c0_7 = arith.constant 0 : index
    %5 = vector.load %arg3[%c0_6, %c0_7] : memref<1x32xf32, #tpu.memory_space<vmem>>, vector<1x32xf32>
    %6 = vector.broadcast %5 : vector<1x32xf32> to vector<64x32xf32>
    %7 = arith.addf %4, %6 : vector<64x32xf32>
    %cst_8 = arith.constant 0.000000e+00 : f32
    %8 = vector.broadcast %cst_8 : f32 to vector<64x32xf32>
    %9 = arith.maximumf %7, %8 : vector<64x32xf32>
    %c0_9 = arith.constant 0 : index
    %c0_10 = arith.constant 0 : index
    %10 = vector.load %arg4[%c0_9, %c0_10] : memref<32x128xf32, #tpu.memory_space<vmem>>, vector<32x128xf32>
    %cst_11 = arith.constant dense<0.000000e+00> : vector<64x128xf32>
    %11 = tpu.matmul %9, %10, %cst_11 {dimension_numbers = #tpu.dot_dimension_numbers<[1], [0], [0], [1], [0, 0, 1, 1], [], []>} : vector<64x32xf32>, vector<32x128xf32>, vector<64x128xf32> -> vector<64x128xf32>
    %cst_12 = arith.constant dense<0.000000e+00> : vector<64x128xf32>
    %12 = tpu.matmul %1, %11, %cst_12 {dimension_numbers = #tpu.dot_dimension_numbers<[1], [0], [0], [1], [0, 0, 1, 1], [], []>} : vector<64x64xf32>, vector<64x128xf32>, vector<64x128xf32> -> vector<64x128xf32>
    %c0_13 = arith.constant 0 : index
    %c0_14 = arith.constant 0 : index
    %13 = vector.load %arg5[%c0_13, %c0_14] : memref<1x128xf32, #tpu.memory_space<vmem>>, vector<1x128xf32>
    %14 = vector.broadcast %13 : vector<1x128xf32> to vector<64x128xf32>
    %15 = arith.addf %12, %14 : vector<64x128xf32>
    %16 = tpu.iota {dimensions = array<i32: 1>} : vector<64x128xi32>
    %c7_i32 = arith.constant 7 : i32
    %17 = vector.broadcast %c7_i32 : i32 to vector<64x128xi32>
    %18 = arith.cmpi slt, %16, %17 : vector<64x128xi32>
    %cst_15 = arith.constant -3.000000e+38 : f32
    %19 = vector.broadcast %cst_15 : f32 to vector<64x128xf32>
    %20 = arith.select %18, %15, %19 : vector<64x128xi1>, vector<64x128xf32>
    %cst_16 = arith.constant dense<0xFF800000> : vector<64xf32>
    %21 = vector.multi_reduction <maximumf>, %20, %cst_16 [1] : vector<64x128xf32> to vector<64xf32>
    %22 = vector.shape_cast %21 : vector<64xf32> to vector<64x1xf32>
    %23 = vector.broadcast %22 : vector<64x1xf32> to vector<64x128xf32>
    %24 = arith.subf %15, %23 : vector<64x128xf32>
    %25 = math.exp %24 : vector<64x128xf32>
    %cst_17 = arith.constant 0.000000e+00 : f32
    %26 = vector.broadcast %cst_17 : f32 to vector<64x128xf32>
    %27 = arith.select %18, %25, %26 : vector<64x128xi1>, vector<64x128xf32>
    %cst_18 = arith.constant dense<0.000000e+00> : vector<64xf32>
    %28 = vector.multi_reduction <add>, %27, %cst_18 [1] : vector<64x128xf32> to vector<64xf32>
    %29 = vector.shape_cast %28 : vector<64xf32> to vector<64x1xf32>
    %30 = math.log %29 : vector<64x1xf32>
    %31 = vector.broadcast %22 : vector<64x1xf32> to vector<64x128xf32>
    %32 = arith.subf %15, %31 : vector<64x128xf32>
    %33 = vector.broadcast %30 : vector<64x1xf32> to vector<64x128xf32>
    %34 = arith.subf %32, %33 : vector<64x128xf32>
    %c0_19 = arith.constant 0 : index
    %c0_20 = arith.constant 0 : index
    %35 = vector.load %arg6[%c0_19, %c0_20] : memref<64x128xf32, #tpu.memory_space<vmem>>, vector<64x128xf32>
    tpu.vector_store %arg6[%c0_19, %c0_20], %34 {strides = array<i32>} : memref<64x128xf32, #tpu.memory_space<vmem>>, vector<64x128xf32>,
    return
  }
}

</mosaic_0001>

<bundles_post_ra>
// kernel: _gcn_call.1
= control target key start
LH: loop header
LB: loop body
LE: loop exit
PB: predicated region body
PF: predicated region fallthrough
CT: control target
= control target key end

     0   :  { %11 = vsyncpa [#allocation3], 0  ;;  %s990_s21 = smov [#allocation2]   ;;  %s1257_s0 = inlined_call_operand.vmem [shape: f32[64,32], index: 0, kind: input, shape index: {}]   ;;  %s1258_s1 = inlined_call_operand.vmem [shape: f32[64,64], index: 1, kind: input, shape index: {}]   ;;  %s1259_s2 = inlined_call_operand.vmem [shape: f32[32,32], index: 2, kind: input, shape index: {}]   ;;  %s1260_s3 = inlined_call_operand.vmem [shape: f32[1,32], index: 3, kind: input, shape index: {}]   ;;  %s1261_s4 = inlined_call_operand.hbm [shape: f32[32,128], index: 4, kind: input, shape index: {}]   ;;  %s1262_s5 = inlined_call_operand.vmem [shape: f32[1,128], index: 5, kind: input, shape index: {}]   ;;  %s1263_s6 = inlined_call_operand.vmem [shape: f32[64,128], index: 6, kind: output, shape index: {}]  }
   0x1   :  { %s25_s22 = sshll.u32 %s990_s21, 4  ;;  %s966_s25 = scalar_lea.hbm %s1261_s4, 512  ;;  %s26_s22 = int_to_ptr.vmem [resolvable:$true] %s25_s22 }
   0x2   :  { %p967_p0 = scmp.ne.s32.totalorder %s1261_s4, %s966_s25  ;;  %p970_p1 = scmp.lt.u32.totalorder %s966_s25, %s1261_s4 }
   0x4   :  { %p972_p2 = pnand %p970_p1, %p967_p0 }
   0x6   :  { %975 = shalt.err (!%p972_p2)
}
   0x7   :  { %s976_s30 = scalar_lea.vmem %s26_s22, 512  ;;  %p981_p4 = scmp.lt.s32.totalorder %s26_s22, %s26_s22 }
   0x8   :  { %p977_p3 = scmp.ne.s32.totalorder %s26_s22, %s976_s30  ;;  %p982_p5 = scmp.lt.s32.totalorder %s976_s30, %s976_s30 }
   0xa   :  { %p983_p6 = por %p982_p5, %p981_p4 }
   0xc   :  { %p984_p7 = pnand %p983_p6, %p977_p3 }
   0xe   :  { %987 = shalt.err (!%p984_p7)
}
   0xf   :  { %s991_s7 = smov 128   ;;  %s992_s8 = smov 8  }
  0x10   :  { %31 = dma.hbm_to_vmem [thread:$0]  %s1261_s4, 512, %s26_s22, [#allocation3], %s991_s7, %s991_s7, %s992_s8  }
  0x11   :  { %988 = dma.done.wait [#allocation3], 512  }
  0x12   :  { %989 = vsyncadd [#allocation3], 4294966784  ;;  %vm57_vm0 = vcmask 261120   ;;  %v53_v0 = vld [vmem:[%s1259_s2] sm:$0xff]  ;;  %v54_v1 = vld [vmem:[%s1259_s2 + $0x8] sm:$0xff]  ;;  %vm194_vm1 = vcmask 523264  }
  0x13   :  { %v55_v2 = vld [vmem:[%s1259_s2 + $0x10] sm:$0xff]  ;;  %v875_v3 = vpack.c.bf16 %v54_v1, %v53_v0  ;;  %v56_v4 = vld [vmem:[%s1259_s2 + $0x18] sm:$0xff]  ;;  %v37_v5 = vld [vmem:[%s1257_s0] sm:$0xff] }
  0x14   :  { %v879_v6 = vpack.c.bf16 %v56_v4, %v55_v2  ;;  %787 = vmatprep.mubr.msk.f32.mxu0 %vm57_vm0, %v37_v5  ;;  %v38_v7 = vld [vmem:[%s1257_s0 + $0x8] sm:$0xff]  ;;  %v39_v8 = vld [vmem:[%s1257_s0 + $0x10] sm:$0xff]  ;;  %v40_v9 = vld [vmem:[%s1257_s0 + $0x18] sm:$0xff] }
  0x15   :  { %876 = vmatprep.subr.bf16.mxu0 %v875_v3  ;;  %v41_v10 = vld [vmem:[%s1257_s0 + $0x20] sm:$0xff]  ;;  %v42_v11 = vld [vmem:[%s1257_s0 + $0x28] sm:$0xff]  ;;  %v43_v12 = vld [vmem:[%s1257_s0 + $0x30] sm:$0xff] }
  0x16   :  { %878 = vmatpush3.bf16.msra.mxu0 %v875_v3  ;;  %v44_v13 = vld [vmem:[%s1257_s0 + $0x38] sm:$0xff]  ;;  %v1087_v14 = vld [vmem:[%s1258_s1] sm:$0xff]  ;;  %v333_v16 = vld [vmem:[#allocation2 + $0x8] sm:$0xff] }
  0x17   :  { %880 = vmatprep.subr.bf16.mxu0 %v879_v6  ;;  %815 = vmatprep.mubr.msk.f32.mxu1 %vm194_vm1, %v1087_v14  ;;  %v332_v15 = vld [vmem:[#allocation2] sm:$0xff]  ;;  %v334_v17 = vld [vmem:[#allocation2 + $0x10] sm:$0xff]  ;;  %v335_v19 = vld [vmem:[#allocation2 + $0x18] sm:$0xff] }
  0x18   :  { %v899_v18 = vpack.c.bf16 %v333_v16, %v332_v15  ;;  %v903_v20 = vpack.c.bf16 %v335_v19, %v334_v17  ;;  %v1094_v33 = vld [vmem:[%s1258_s1 + $0x8] sm:$0xff]  ;;  %v47_v34 = vld [vmem:[%s1258_s1 + $0x10] sm:$0xff]  ;;  %v1105_v35 = vld [vmem:[%s1258_s1 + $0x18] sm:$0xff] }
  0x19   :  { %v1110_v36 = vld [vmem:[%s1258_s1 + $0x20] sm:$0xff]  ;;  %v1119_v37 = vld [vmem:[%s1258_s1 + $0x28] sm:$0xff]  ;;  %v1124_v38 = vld [vmem:[%s1258_s1 + $0x30] sm:$0xff] }
  0x1a   :  { %882 = vmatpush3.bf16.msra.mxu0 %v879_v6  ;;  %v1133_v39 = vld [vmem:[%s1258_s1 + $0x38] sm:$0xff]  ;;  %v697_v40 = vld [vmem:[%s1260_s3] ss:$0 sm:$0xff] }
  0x1b   :  { %900 = vmatprep.subr.bf16.mxu0 %v899_v18  ;;  %v714_v15 = vld [vmem:[%s1262_s5] ss:$0 sm:$0xff] }
  0x1d   :  { %788 = vmatmul.mubr.msk.f32.vlgmr.msra.gmra.mrb[0].mxu0 %vm57_vm0, %v38_v7 }
  0x1e   :  { %790 = vmatprep.mubr.msk.f32.mxu0 %vm57_vm0, %v39_v8  ;;  %902 = vmatpush3.bf16.msra.mxu0 %v899_v18 }
  0x1f   :  { %904 = vmatprep.subr.bf16.mxu0 %v903_v20 }
  0x21   :  { %791 = vmatmul.mubr.msk.f32.gmra.mrb[2].mxu0 %vm57_vm0, %v40_v9 }
  0x22   :  { %793 = vmatprep.mubr.msk.f32.mxu0 %vm57_vm0, %v41_v10  ;;  %906 = vmatpush3.bf16.msra.mxu0 %v903_v20 }
  0x25   :  { %794 = vmatmul.mubr.msk.f32.gmra.mrb[4].mxu0 %vm57_vm0, %v42_v11 }
  0x26   :  { %796 = vmatprep.mubr.msk.f32.mxu0 %vm57_vm0, %v43_v12 }
  0x29   :  { %797 = vmatmul.mubr.msk.f32.gmra.mrb[6].mxu0 %vm57_vm0, %v44_v13  ;;  %v577_v13 = vlaneseq }
  0xf0   :  { %v789_v21 = vpop.f32.mrb[0].mxu0 }
  0xf1   :  { %v148_v22 = vpop.f32.mrb[1].mxu0 }
  0xf2   :  { %v883_v23 = vpack.c.bf16 %v789_v21, %v148_v22 }
  0xf4   :  { %v792_v24 = vpop.f32.mrb[2].mxu0  ;;  %884 = vmatprep.subr.bf16.mxu1 %v883_v23 }
  0xf5   :  { %v158_v25 = vpop.f32.mrb[3].mxu0  ;;  %886 = vmatpush3.bf16.msra.mxu1 %v883_v23 }
  0xf6   :  { %v887_v26 = vpack.c.bf16 %v792_v24, %v158_v25 }
  0xf8   :  { %v795_v27 = vpop.f32.mrb[4].mxu0  ;;  %888 = vmatprep.subr.bf16.mxu1 %v887_v26 }
  0xf9   :  { %v168_v28 = vpop.f32.mrb[5].mxu0  ;;  %890 = vmatpush3.bf16.msra.mxu1 %v887_v26 }
  0xfa   :  { %v891_v29 = vpack.c.bf16 %v795_v27, %v168_v28 }
  0xfc   :  { %v798_v30 = vpop.f32.mrb[6].mxu0  ;;  %892 = vmatprep.subr.bf16.mxu1 %v891_v29 }
  0xfd   :  { %v178_v31 = vpop.f32.mrb[7].mxu0  ;;  %894 = vmatpush3.bf16.msra.mxu1 %v891_v29 }
  0xfe   :  { %v895_v32 = vpack.c.bf16 %v798_v30, %v178_v31 }
 0x100   :  { %896 = vmatprep.subr.bf16.mxu1 %v895_v32 }
 0x101   :  { %898 = vmatpush3.bf16.msra.mxu1 %v895_v32 }
 0x104   :  { %816 = vmatmul.mubr.msk.f32.vlgmr.msra.gmra.mrb[0].mxu1 %vm194_vm1, %v1094_v33 }
 0x105   :  { %818 = vmatprep.mubr.msk.f32.mxu1 %vm194_vm1, %v47_v34 }
 0x108   :  { %819 = vmatmul.mubr.msk.f32.gmra.mrb[2].mxu1 %vm194_vm1, %v1105_v35 }
 0x109   :  { %821 = vmatprep.mubr.msk.f32.mxu1 %vm194_vm1, %v1110_v36 }
 0x10c   :  { %822 = vmatmul.mubr.msk.f32.gmra.mrb[4].mxu1 %vm194_vm1, %v1119_v37 }
 0x10d   :  { %824 = vmatprep.mubr.msk.f32.mxu1 %vm194_vm1, %v1124_v38 }
 0x110   :  { %825 = vmatmul.mubr.msk.f32.gmra.mrb[6].mxu1 %vm194_vm1, %v1133_v39 }
 0x111   :  { %866 = vmatprep.mubr.msk.f32.mxu1 %vm194_vm1, %v47_v34 }
 0x1d7   :  { %v817_v41 = vpop.f32.mrb[0].mxu1 }
 0x1d8   :  { %v291_v42 = vadd.f32 %v817_v41, %v697_v40  ;;  %v285_v43 = vpop.f32.mrb[1].mxu1 }
 0x1d9   :  { %v286_v44 = vadd.f32 %v697_v40, %v285_v43 }
 0x1da   :  { %v325_v47 = vmax.f32 %v291_v42, 0.0 }
 0x1db   :  { %v324_v45 = vmax.f32 %v286_v44, 0.0  ;;  %v820_v46 = vpop.f32.mrb[2].mxu1 }
 0x1dc   :  { %v301_v48 = vadd.f32 %v820_v46, %v697_v40  ;;  %v295_v49 = vpop.f32.mrb[3].mxu1 }
 0x1dd   :  { %v296_v50 = vadd.f32 %v697_v40, %v295_v49  ;;  %835 = vmatprep.mubr.msk.f32.mxu0 %vm57_vm0, %v324_v45 }
 0x1de   :  { %836 = vmatmul.mubr.msk.f32.vlgmr.msra.gmra.mrb[8].mxu0 %vm57_vm0, %v325_v47  ;;  %v327_v53 = vmax.f32 %v301_v48, 0.0 }
 0x1df   :  { %v326_v51 = vmax.f32 %v296_v50, 0.0  ;;  %v823_v52 = vpop.f32.mrb[4].mxu1 }
 0x1e0   :  { %v311_v54 = vadd.f32 %v823_v52, %v697_v40  ;;  %v305_v55 = vpop.f32.mrb[5].mxu1 }
 0x1e1   :  { %v306_v56 = vadd.f32 %v697_v40, %v305_v55  ;;  %838 = vmatprep.mubr.msk.f32.mxu0 %vm57_vm0, %v326_v51 }
 0x1e2   :  { %839 = vmatmul.mubr.msk.f32.gmra.mrb[10].mxu0 %vm57_vm0, %v327_v53  ;;  %v329_v59 = vmax.f32 %v311_v54, 0.0 }
 0x1e3   :  { %v328_v57 = vmax.f32 %v306_v56, 0.0  ;;  %v826_v58 = vpop.f32.mrb[6].mxu1 }
 0x1e4   :  { %v321_v60 = vadd.f32 %v826_v58, %v697_v40  ;;  %v315_v61 = vpop.f32.mrb[7].mxu1 }
 0x1e5   :  { %v316_v62 = vadd.f32 %v697_v40, %v315_v61  ;;  %841 = vmatprep.mubr.msk.f32.mxu0 %vm57_vm0, %v328_v57 }
 0x1e6   :  { %842 = vmatmul.mubr.msk.f32.gmra.mrb[12].mxu0 %vm57_vm0, %v329_v59  ;;  %v331_v0 = vmax.f32 %v321_v60, 0.0 }
 0x1e7   :  { %v330_v63 = vmax.f32 %v316_v62, 0.0 }
 0x1e9   :  { %844 = vmatprep.mubr.msk.f32.mxu0 %vm57_vm0, %v330_v63 }
 0x1ea   :  { %845 = vmatmul.mubr.msk.f32.gmra.mrb[14].mxu0 %vm57_vm0, %v331_v0 }
 0x1eb   :  { %863 = vmatprep.mubr.msk.f32.mxu0 %vm194_vm1, %v1087_v14  ;;  %v1163_v14 = vand.u32 127, %v577_v13 }
 0x1ed   :  { %vm579_vm2 = vcmp.lt.s32.totalorder %v1163_v14, 7 }
 0x2b1   :  { %v837_v1 = vpop.f32.mrb[8].mxu0 }
 0x2b2   :  { %v426_v2 = vpop.f32.mrb[9].mxu0 }
 0x2b3   :  { %v907_v3 = vpack.c.bf16 %v837_v1, %v426_v2 }
 0x2b5   :  { %v840_v4 = vpop.f32.mrb[10].mxu0  ;;  %908 = vmatprep.subr.bf16.mxu0 %v907_v3  ;;  %923 = vmatprep.subr.bf16.mxu1 %v907_v3 }
 0x2b6   :  { %v436_v5 = vpop.f32.mrb[11].mxu0  ;;  %910 = vmatpush3.bf16.msra.mxu0 %v907_v3  ;;  %927 = vmatpush3.bf16.msra.mxu1 %v907_v3 }
 0x2b7   :  { %v911_v6 = vpack.c.bf16 %v840_v4, %v436_v5 }
 0x2b9   :  { %v843_v7 = vpop.f32.mrb[12].mxu0  ;;  %912 = vmatprep.subr.bf16.mxu0 %v911_v6  ;;  %924 = vmatprep.subr.bf16.mxu1 %v911_v6 }
 0x2ba   :  { %v446_v8 = vpop.f32.mrb[13].mxu0  ;;  %914 = vmatpush3.bf16.msra.mxu0 %v911_v6  ;;  %928 = vmatpush3.bf16.msra.mxu1 %v911_v6 }
 0x2bb   :  { %v915_v9 = vpack.c.bf16 %v843_v7, %v446_v8 }
 0x2bd   :  { %v846_v10 = vpop.f32.mrb[14].mxu0  ;;  %916 = vmatprep.subr.bf16.mxu0 %v915_v9  ;;  %925 = vmatprep.subr.bf16.mxu1 %v915_v9 }
 0x2be   :  { %v456_v11 = vpop.f32.mrb[15].mxu0  ;;  %918 = vmatpush3.bf16.msra.mxu0 %v915_v9  ;;  %929 = vmatpush3.bf16.msra.mxu1 %v915_v9 }
 0x2bf   :  { %v919_v12 = vpack.c.bf16 %v846_v10, %v456_v11 }
 0x2c1   :  { %920 = vmatprep.subr.bf16.mxu0 %v919_v12  ;;  %926 = vmatprep.subr.bf16.mxu1 %v919_v12 }
 0x2c2   :  { %922 = vmatpush3.bf16.msra.mxu0 %v919_v12  ;;  %930 = vmatpush3.bf16.msra.mxu1 %v919_v12 }
 0x2c5   :  { %864 = vmatmul.mubr.msk.f32.vlgmr.msra.gmra.mrb[16].mxu0 %vm194_vm1, %v1094_v33  ;;  %867 = vmatmul.mubr.msk.f32.vlgmr.msra.gmra.mrb[8].mxu1 %vm194_vm1, %v1105_v35 }
 0x2c6   :  { %869 = vmatprep.mubr.msk.f32.mxu1 %vm194_vm1, %v1110_v36 }
 0x2c9   :  { %870 = vmatmul.mubr.msk.f32.gmra.mrb[10].mxu1 %vm194_vm1, %v1119_v37 }
 0x2ca   :  { %872 = vmatprep.mubr.msk.f32.mxu1 %vm194_vm1, %v1124_v38 }
 0x2cd   :  { %873 = vmatmul.mubr.msk.f32.gmra.mrb[12].mxu1 %vm194_vm1, %v1133_v39 }
 0x398   :  { %v865_v16 = vpop.f32.mrb[16].mxu0  ;;  %v868_v17 = vpop.f32.mrb[8].mxu1 }
 0x399   :  { %v544_v18 = vadd.f32 %v865_v16, %v714_v15  ;;  %v554_v19 = vadd.f32 %v868_v17, %v714_v15  ;;  %v538_v20 = vpop.f32.mrb[17].mxu0  ;;  %v548_v21 = vpop.f32.mrb[9].mxu1 }
 0x39a   :  { %v549_v22 = vadd.f32 %v714_v15, %v548_v21  ;;  %v539_v23 = vadd.f32 %v714_v15, %v538_v20 }
 0x39b   :  { %v583_v24 = vsel %vm579_vm2, %v554_v19, -3e+38  ;;  %v581_v25 = vsel %vm579_vm2, %v544_v18, -3e+38 }
 0x39c   :  { %594 = vmax.xlane.f32.xlu1 %v583_v24  ;;  %590 = vmax.xlane.f32.xlu0 %v581_v25  ;;  %v871_v26 = vpop.f32.mrb[10].mxu1  ;;  %v582_v29 = vsel %vm579_vm2, %v549_v22, -3e+38  ;;  %v580_v31 = vsel %vm579_vm2, %v539_v23, -3e+38 }
 0x39d   :  { %v564_v27 = vadd.f32 %v871_v26, %v714_v15  ;;  %v558_v28 = vpop.f32.mrb[11].mxu1 }
 0x39e   :  { %v559_v30 = vadd.f32 %v714_v15, %v558_v28 }
 0x39f   :  { %v585_v35 = vsel %vm579_vm2, %v564_v27, -3e+38 }
 0x3a0   :  { %592 = vmax.xlane.f32.xlu1 %v582_v29  ;;  %588 = vmax.xlane.f32.xlu0 %v580_v31  ;;  %v874_v32 = vpop.f32.mrb[12].mxu1  ;;  %v584_v36 = vsel %vm579_vm2, %v559_v30, -3e+38 }
 0x3a1   :  { %v574_v33 = vadd.f32 %v874_v32, %v714_v15  ;;  %v568_v34 = vpop.f32.mrb[13].mxu1 }
 0x3a2   :  { %v569_v37 = vadd.f32 %v714_v15, %v568_v34 }
 0x3a3   :  { %v587_v38 = vsel %vm579_vm2, %v574_v33, -3e+38 }
 0x3a4   :  { %598 = vmax.xlane.f32.xlu1 %v585_v35  ;;  %596 = vmax.xlane.f32.xlu0 %v584_v36  ;;  %v586_v39 = vsel %vm579_vm2, %v569_v37, -3e+38 }
 0x3a8   :  { %602 = vmax.xlane.f32.xlu1 %v587_v38  ;;  %600 = vmax.xlane.f32.xlu0 %v586_v39 }
 0x429   :  { %v595_v40 = vpop.xlane.xlu1 %594  ;;  %v591_v41 = vpop.xlane.xlu0 %590 }
 0x42a   :  { %v1185_v42 = vsub.f32 %v554_v19, %v595_v40  ;;  %v1187_v43 = vsub.f32 %v544_v18, %v591_v41 }
 0x42c   :  { %v614_v44 = vmul.f32 1.442695, %v1187_v43  ;;  %v618_v45 = vmul.f32 1.442695, %v1185_v42 }
 0x42d   :  { %v593_v46 = vpop.xlane.xlu1 %592  ;;  %v589_v47 = vpop.xlane.xlu0 %588 }
 0x42e   :  { %v1191_v48 = vsub.f32 %v549_v22, %v593_v46  ;;  %v1193_v49 = vsub.f32 %v539_v23, %v589_v47  ;;  %934 = vpow2.f32 %v614_v44 }
 0x42f   :  { %936 = vpow2.f32 %v618_v45 }
 0x430   :  { %v612_v50 = vmul.f32 1.442695, %v1193_v49  ;;  %v616_v51 = vmul.f32 1.442695, %v1191_v48 }
 0x431   :  { %v599_v52 = vpop.xlane.xlu1 %598  ;;  %v597_v53 = vpop.xlane.xlu0 %596 }
 0x432   :  { %v1197_v54 = vsub.f32 %v564_v27, %v599_v52  ;;  %v1199_v55 = vsub.f32 %v559_v30, %v597_v53  ;;  %938 = vpow2.f32 %v612_v50 }
 0x433   :  { %940 = vpow2.f32 %v616_v51 }
 0x434   :  { %v622_v56 = vmul.f32 1.442695, %v1197_v54  ;;  %v620_v57 = vmul.f32 1.442695, %v1199_v55 }
 0x435   :  { %v603_v58 = vpop.xlane.xlu1 %602  ;;  %v601_v59 = vpop.xlane.xlu0 %600 }
 0x436   :  { %942 = vpow2.f32 %v622_v56  ;;  %v1203_v60 = vsub.f32 %v574_v33, %v603_v58  ;;  %v1205_v61 = vsub.f32 %v569_v37, %v601_v59 }
 0x437   :  { %944 = vpow2.f32 %v620_v57 }
 0x438   :  { %v626_v62 = vmul.f32 1.442695, %v1203_v60  ;;  %v935_v63 = vpop.eup %934  ;;  %v624_v0 = vmul.f32 1.442695, %v1205_v61 }
 0x439   :  { %v629_v1 = vsel %vm579_vm2, %v935_v63, 0.0  ;;  %v937_v2 = vpop.eup %936 }
 0x43a   :  { %946 = vpow2.f32 %v626_v62  ;;  %638 = vadd.xlane.f32.xlu1 %v629_v1  ;;  %v631_v4 = vsel %vm579_vm2, %v937_v2, 0.0 }
 0x43b   :  { %948 = vpow2.f32 %v624_v0 }
 0x43c   :  { %v939_v3 = vpop.eup %938 }
 0x43d   :  { %v628_v5 = vsel %vm579_vm2, %v939_v3, 0.0  ;;  %v941_v6 = vpop.eup %940 }
 0x43e   :  { %642 = vadd.xlane.f32.xlu1 %v631_v4  ;;  %636 = vadd.xlane.f32.xlu0 %v628_v5  ;;  %v630_v9 = vsel %vm579_vm2, %v941_v6, 0.0 }
 0x440   :  { %v943_v7 = vpop.eup %942 }
 0x441   :  { %v633_v8 = vsel %vm579_vm2, %v943_v7, 0.0  ;;  %v945_v10 = vpop.eup %944 }
 0x442   :  { %646 = vadd.xlane.f32.xlu1 %v633_v8  ;;  %640 = vadd.xlane.f32.xlu0 %v630_v9  ;;  %v632_v13 = vsel %vm579_vm2, %v945_v10, 0.0 }
 0x444   :  { %v947_v11 = vpop.eup %946 }
 0x445   :  { %v635_v12 = vsel %vm579_vm2, %v947_v11, 0.0  ;;  %v949_v15 = vpop.eup %948 }
 0x446   :  { %650 = vadd.xlane.f32.xlu1 %v635_v12  ;;  %644 = vadd.xlane.f32.xlu0 %v632_v13  ;;  %v634_v16 = vsel %vm579_vm2, %v949_v15, 0.0 }
 0x44a   :  { %648 = vadd.xlane.f32.xlu0 %v634_v16 }
 0x4c7   :  { %v639_v17 = vpop.xlane.xlu1 %638 }
 0x4c8   :  { %950 = vlog2.f32 %v639_v17 }
 0x4cb   :  { %v643_v18 = vpop.xlane.xlu1 %642  ;;  %v637_v19 = vpop.xlane.xlu0 %636 }
 0x4cc   :  { %952 = vlog2.f32 %v643_v18 }
 0x4cd   :  { %954 = vlog2.f32 %v637_v19 }
 0x4cf   :  { %v647_v20 = vpop.xlane.xlu1 %646  ;;  %v641_v21 = vpop.xlane.xlu0 %640 }
 0x4d0   :  { %956 = vlog2.f32 %v647_v20 }
 0x4d1   :  { %958 = vlog2.f32 %v641_v21 }
 0x4d2   :  { %v951_v22 = vpop.eup %950 }
 0x4d3   :  { %v655_v23 = vmul.f32 0.6931472, %v951_v22  ;;  %v651_v24 = vpop.xlane.xlu1 %650  ;;  %v645_v25 = vpop.xlane.xlu0 %644 }
 0x4d4   :  { %960 = vlog2.f32 %v651_v24 }
 0x4d5   :  { %v669_v26 = vsub.f32 %v1187_v43, %v655_v23  ;;  %962 = vlog2.f32 %v645_v25 }
 0x4d6   :  { %v953_v14 = vpop.eup %952 }
 0x4d7   :  { %v955_v27 = vpop.eup %954  ;;  %677 = vst [vmem:[%s1263_s6 + $0x8] sm:$0xff] %v669_v26  ;;  %v659_v28 = vmul.f32 0.6931472, %v953_v14  ;;  %v649_v29 = vpop.xlane.xlu0 %648 }
 0x4d8   :  { %v653_v30 = vmul.f32 0.6931472, %v955_v27  ;;  %964 = vlog2.f32 %v649_v29 }
 0x4d9   :  { %v671_v31 = vsub.f32 %v1185_v42, %v659_v28 }
 0x4da   :  { %v957_v32 = vpop.eup %956  ;;  %v668_v33 = vsub.f32 %v1193_v49, %v653_v30 }
 0x4db   :  { %v959_v34 = vpop.eup %958  ;;  %679 = vst [vmem:[%s1263_s6 + $0x18] sm:$0xff] %v671_v31  ;;  %v663_v35 = vmul.f32 0.6931472, %v957_v32 }
 0x4dc   :  { %676 = vst [vmem:[%s1263_s6] sm:$0xff] %v668_v33  ;;  %v657_v36 = vmul.f32 0.6931472, %v959_v34 }
 0x4dd   :  { %v673_v37 = vsub.f32 %v1197_v54, %v663_v35 }
 0x4de   :  { %v961_v38 = vpop.eup %960  ;;  %v670_v39 = vsub.f32 %v1191_v48, %v657_v36 }
 0x4df   :  { %v963_v40 = vpop.eup %962  ;;  %681 = vst [vmem:[%s1263_s6 + $0x28] sm:$0xff] %v673_v37  ;;  %v667_v41 = vmul.f32 0.6931472, %v961_v38 }
 0x4e0   :  { %678 = vst [vmem:[%s1263_s6 + $0x10] sm:$0xff] %v670_v39  ;;  %v661_v42 = vmul.f32 0.6931472, %v963_v40 }
 0x4e1   :  { %v675_v43 = vsub.f32 %v1203_v60, %v667_v41 }
 0x4e2   :  { %v965_v44 = vpop.eup %964  ;;  %v672_v45 = vsub.f32 %v1199_v55, %v661_v42 }
 0x4e3   :  { %683 = vst [vmem:[%s1263_s6 + $0x38] sm:$0xff] %v675_v43  ;;  %v665_v46 = vmul.f32 0.6931472, %v965_v44 }
 0x4e4   :  { %680 = vst [vmem:[%s1263_s6 + $0x20] sm:$0xff] %v672_v45 }
 0x4e5   :  { %v674_v47 = vsub.f32 %v1205_v61, %v665_v46 }
 0x4e7   :  { %682 = vst [vmem:[%s1263_s6 + $0x30] sm:$0xff] %v674_v47 }
 0x4e8   :  { %688 = vsyncpa [#allocation3], 1 }

</bundles_post_ra>
